<compile_context>
chip_gen: v6e
topology: v6e:2x2x1
jax: 0.10.0
libtpu: 0.0.40
codegen_flags: <defaults>
</compile_context>

<pallas_src>
import jax
import jax.numpy as jnp
from jax.experimental import pallas as pl
from jax.experimental.pallas import tpu as pltpu


def _round_up(x: int, m: int) -> int:
    return (x + m - 1) // m * m


def _pick_tn(D: int, max_tn: int) -> int:
    """Largest N tile that divides D, is a multiple of 128, and <= max_tn."""
    if D % 128 != 0:
        return D          # block == full dim is always legal
    for tn in (512, 384, 256, 128):
        if tn <= max_tn and D % tn == 0:
            return tn
    return 128


# ----------------------------------------------------------------------------
# Fused kernel: out = relu(relu(x @ W1 + b1) @ W2[:, j-tile] + b2[j-tile])
# ----------------------------------------------------------------------------
def _timestep_embedding_kernel(x_ref, w1_ref, b1_ref, w2_ref, b2_ref, o_ref):
    # x:(bm,Cin)  w1:(Cin,D)  b1:(1,D)  w2:(D,tn)  b2:(1,tn)  o:(bm,tn)
    h = jnp.dot(x_ref[...], w1_ref[...], preferred_element_type=jnp.float32)
    h = jnp.maximum(h + b1_ref[...], 0.0).astype(w2_ref.dtype)
    y = jnp.dot(h, w2_ref[...], preferred_element_type=jnp.float32)
    o_ref[...] = jnp.maximum(y + b2_ref[...], 0.0).astype(o_ref.dtype)


# ----------------------------------------------------------------------------
# Wrapper
# ----------------------------------------------------------------------------
def timestep_embedding(curr_t, T, w1, b1, w2, b2, *,
                       block_m: int = 256, block_n: int = 512,
                       use_bf16: bool = True):
    """Forward pass of TimestepEmbedding.

    curr_t: (B, in_channels) f32
    T:      unused (signature parity with the PyTorch module)
    w1:     (in_channels, embedding_dim)    -- transposed vs. nn.Linear.weight
    b1:     (embedding_dim,)
    w2:     (embedding_dim, embedding_dim)  -- transposed vs. nn.Linear.weight
    b2:     (embedding_dim,)
    returns (B, embedding_dim) f32
    """
    del T  # not used by the reference forward either
    B, Cin = curr_t.shape
    D = w1.shape[1]

    cdt = jnp.bfloat16 if use_bf16 else jnp.float32
    csz = jnp.dtype(cdt).itemsize

    # M tile: pad batch to the (packed) sublane multiple, cap at block_m.
    sub = 16 if use_bf16 else 8
    bm = min(_round_up(block_m, sub), _round_up(B, sub))
    Bp = _round_up(B, bm)

    # Lane-dense K for the first matmul (zero padding is numerically neutral).
    cin_p = _round_up(Cin, 128)
    # N tile over embedding_dim (second grid axis).
    tn = _pick_tn(D, block_n)
    n_i, n_j = Bp // bm, D // tn

    x = jnp.pad(curr_t.astype(cdt), ((0, Bp - B), (0, cin_p - Cin)))
    w1c = jnp.pad(w1.astype(cdt), ((0, cin_p - Cin), (0, 0)))
    w2c = w2.astype(cdt)
    b1r = b1.astype(jnp.float32).reshape(1, D)
    b2r = b2.astype(jnp.float32).reshape(1, D)

    # Explicit scoped-VMEM limit from the real block footprint (with headroom),
    # capped at 64 MiB so it is valid on v7x as well as v5e/v6e.
    est = (2 * bm * cin_p * csz                                  # x (2 bufs)
           + 1 * cin_p * D * csz + 1 * D * 4                     # W1, b1 (1 buf)
           + (1 if n_j == 1 else 2) * (D * tn * csz + tn * 4)    # W2, b2
           + 2 * bm * tn * 4                                     # out (2 bufs)
           + bm * D * 4 + bm * tn * 4)                           # f32 intermediates
    vmem_limit = int(min(64 << 20, max(32 << 20, 2 * est)))

    def build(single_buffer: bool):
        def spec(shape, idx, const_index):
            if single_buffer and const_index:
                # Constant index_map -> single buffer; double-buffering it is
                # pure VMEM waste.
                return pl.BlockSpec(shape, idx, pipeline_mode=pl.Buffered(1))
            return pl.BlockSpec(shape, idx)

        return pl.pallas_call(
            _timestep_embedding_kernel,
            out_shape=jax.ShapeDtypeStruct((Bp, D), jnp.float32),
            grid=(n_i, n_j),
            in_specs=[
                pl.BlockSpec((bm, cin_p), lambda i, j: (i, 0)),       # x
                spec((cin_p, D), lambda i, j: (0, 0), True),          # W1
                spec((1, D), lambda i, j: (0, 0), True),              # b1
                spec((D, tn), lambda i, j: (0, j), n_j == 1),         # W2
                spec((1, tn), lambda i, j: (0, j), n_j == 1),         # b2
            ],
            out_specs=pl.BlockSpec((bm, tn), lambda i, j: (i, j)),
            compiler_params=pltpu.CompilerParams(
                dimension_semantics=("parallel", "parallel"),
                vmem_limit_bytes=vmem_limit,
            ),
        )

    args = (x, w1c, b1r, w2c, b2r)
    try:
        out = jax.block_until_ready(build(single_buffer=True)(*args))
    except Exception:
        # Fallback if this jax build rejects per-BlockSpec pipeline_mode hints.
        out = jax.block_until_ready(build(single_buffer=False)(*args))
    return out[:B]


# ----------------------------------------------------------------------------
# Deterministic parameter init (weights stored as (in, out), i.e. W.T of torch)
# ----------------------------------------------------------------------------
def init_params(key, in_channels, embedding_dim):
    k1, k2 = jax.random.split(key, 2)
    w1 = jax.random.normal(k1, (in_channels, embedding_dim), jnp.float32)
    w1 = w1 / jnp.sqrt(float(in_channels))
    b1 = jnp.zeros((embedding_dim,), jnp.float32)
    w2 = jax.random.normal(k2, (embedding_dim, embedding_dim), jnp.float32)
    w2 = w2 / jnp.sqrt(float(embedding_dim))
    b2 = jnp.zeros((embedding_dim,), jnp.float32)
    return w1, b1, w2, b2


def _reference(curr_t, w1, b1, w2, b2, use_bf16=True):
    # Numerics-matched reference: same bf16 operand casts, f32 accumulation.
    cdt = jnp.bfloat16 if use_bf16 else jnp.float32
    h = jnp.dot(curr_t.astype(cdt), w1.astype(cdt),
                preferred_element_type=jnp.float32) + b1
    h = jax.nn.relu(h).astype(cdt)
    y = jnp.dot(h, w2.astype(cdt), preferred_element_type=jnp.float32) + b2
    return jax.nn.relu(y)


# ----------------------------------------------------------------------------
if __name__ == "__main__":
    key = jax.random.PRNGKey(0)
    kx, kp = jax.random.split(key, 2)

    # Small shapes consistent with the module; embedding_dim kept lane-dense.
    B, in_channels, embedding_dim = 2, 32, 128

    curr_t = jax.random.normal(kx, (B, in_channels), jnp.float32)
    T = jnp.asarray(1000, jnp.int32)   # unused by the forward (matches reference)

    w1, b1, w2, b2 = init_params(kp, in_channels, embedding_dim)

    out = timestep_embedding(curr_t, T, w1, b1, w2, b2)
    out = jax.block_until_ready(out)

    assert out.shape == (B, embedding_dim)
    assert out.dtype == jnp.float32

    # bf16 operands deviate from the pure-f32 PyTorch reference by ~1e-2, so we
    # validate against a numerics-matched reference with relaxed tolerance.
    ref = _reference(curr_t, w1, b1, w2, b2, use_bf16=True)
    max_err = float(jnp.max(jnp.abs(out - ref)))
    assert jnp.allclose(out, ref, atol=2e-2, rtol=2e-2), max_err

    print("KERNEL_OK")
</pallas_src>

<mosaic_0001>
module attributes {stable_mosaic.version = 11 : i64} {
  func.func @_timestep_embedding_kernel(%arg0: i32, %arg1: i32, %arg2: memref<16x128xbf16, #tpu.memory_space<vmem>>, %arg3: memref<128x128xbf16, #tpu.memory_space<vmem>>, %arg4: memref<1x128xf32, #tpu.memory_space<vmem>>, %arg5: memref<128x128xbf16, #tpu.memory_space<vmem>>, %arg6: memref<1x128xf32, #tpu.memory_space<vmem>>, %arg7: memref<16x128xf32, #tpu.memory_space<vmem>>) attributes {dimension_semantics = [#tpu.dimension_semantics<parallel>, #tpu.dimension_semantics<parallel>], iteration_bounds = array<i64: 1, 1>, scalar_prefetch = 0 : i64, scratch_operands = 0 : i64, tpu.core_type = #tpu.core_type<tc>, window_params = [{transform_indices = @transform_0, window_bounds = array<i64: 16, 128>}, {pipeline_mode = #tpu.pipeline_mode<synchronous>, transform_indices = @transform_1, window_bounds = array<i64: 128, 128>}, {pipeline_mode = #tpu.pipeline_mode<synchronous>, transform_indices = @transform_2, window_bounds = array<i64: 1, 128>}, {pipeline_mode = #tpu.pipeline_mode<synchronous>, transform_indices = @transform_3, window_bounds = array<i64: 128, 128>}, {pipeline_mode = #tpu.pipeline_mode<synchronous>, transform_indices = @transform_4, window_bounds = array<i64: 1, 128>}, {transform_indices = @transform_5, window_bounds = array<i64: 16, 128>}]} {
    %c0 = arith.constant 0 : index
    %c0_0 = arith.constant 0 : index
    %0 = vector.load %arg2[%c0, %c0_0] : memref<16x128xbf16, #tpu.memory_space<vmem>>, vector<16x128xbf16>
    %c0_1 = arith.constant 0 : index
    %c0_2 = arith.constant 0 : index
    %1 = vector.load %arg3[%c0_1, %c0_2] : memref<128x128xbf16, #tpu.memory_space<vmem>>, vector<128x128xbf16>
    %cst = arith.constant dense<0.000000e+00> : vector<16x128xf32>
    %2 = tpu.matmul %0, %1, %cst {dimension_numbers = #tpu.dot_dimension_numbers<[1], [0], [0], [1], [0, 0, 1, 1], [], []>} : vector<16x128xbf16>, vector<128x128xbf16>, vector<16x128xf32> -> vector<16x128xf32>
    %c0_3 = arith.constant 0 : index
    %c0_4 = arith.constant 0 : index
    %3 = vector.load %arg4[%c0_3, %c0_4] : memref<1x128xf32, #tpu.memory_space<vmem>>, vector<1x128xf32>
    %4 = vector.broadcast %3 : vector<1x128xf32> to vector<16x128xf32>
    %5 = arith.addf %2, %4 : vector<16x128xf32>
    %cst_5 = arith.constant 0.000000e+00 : f32
    %6 = vector.broadcast %cst_5 : f32 to vector<16x128xf32>
    %7 = arith.maximumf %5, %6 : vector<16x128xf32>
    %8 = arith.truncf %7 : vector<16x128xf32> to vector<16x128xbf16>
    %c0_6 = arith.constant 0 : index
    %c0_7 = arith.constant 0 : index
    %9 = vector.load %arg5[%c0_6, %c0_7] : memref<128x128xbf16, #tpu.memory_space<vmem>>, vector<128x128xbf16>
    %cst_8 = arith.constant dense<0.000000e+00> : vector<16x128xf32>
    %10 = tpu.matmul %8, %9, %cst_8 {dimension_numbers = #tpu.dot_dimension_numbers<[1], [0], [0], [1], [0, 0, 1, 1], [], []>} : vector<16x128xbf16>, vector<128x128xbf16>, vector<16x128xf32> -> vector<16x128xf32>
    %c0_9 = arith.constant 0 : index
    %c0_10 = arith.constant 0 : index
    %11 = vector.load %arg6[%c0_9, %c0_10] : memref<1x128xf32, #tpu.memory_space<vmem>>, vector<1x128xf32>
    %12 = vector.broadcast %11 : vector<1x128xf32> to vector<16x128xf32>
    %13 = arith.addf %10, %12 : vector<16x128xf32>
    %cst_11 = arith.constant 0.000000e+00 : f32
    %14 = vector.broadcast %cst_11 : f32 to vector<16x128xf32>
    %15 = arith.maximumf %13, %14 : vector<16x128xf32>
    %c0_12 = arith.constant 0 : index
    %c0_13 = arith.constant 0 : index
    %16 = vector.load %arg7[%c0_12, %c0_13] : memref<16x128xf32, #tpu.memory_space<vmem>>, vector<16x128xf32>
    tpu.vector_store %arg7[%c0_12, %c0_13], %15 {strides = array<i32>} : memref<16x128xf32, #tpu.memory_space<vmem>>, vector<16x128xf32>,
    return
  }
  func.func @transform_0(%arg0: i32, %arg1: i32) -> (i32, i32) {
    %c0_i32 = arith.constant 0 : i32
    %c0_i32_0 = arith.constant 0 : i32
    return %arg0, %c0_i32 : i32, i32
  }
  func.func @transform_1(%arg0: i32, %arg1: i32) -> (i32, i32) {
    %c0_i32 = arith.constant 0 : i32
    %c0_i32_0 = arith.constant 0 : i32
    %c0_i32_1 = arith.constant 0 : i32
    return %c0_i32, %c0_i32_0 : i32, i32
  }
  func.func @transform_2(%arg0: i32, %arg1: i32) -> (i32, i32) {
    %c0_i32 = arith.constant 0 : i32
    %c0_i32_0 = arith.constant 0 : i32
    %c0_i32_1 = arith.constant 0 : i32
    return %c0_i32, %c0_i32_0 : i32, i32
  }
  func.func @transform_3(%arg0: i32, %arg1: i32) -> (i32, i32) {
    %c0_i32 = arith.constant 0 : i32
    %c0_i32_0 = arith.constant 0 : i32
    return %c0_i32, %arg1 : i32, i32
  }
  func.func @transform_4(%arg0: i32, %arg1: i32) -> (i32, i32) {
    %c0_i32 = arith.constant 0 : i32
    %c0_i32_0 = arith.constant 0 : i32
    return %c0_i32, %arg1 : i32, i32
  }
  func.func @transform_5(%arg0: i32, %arg1: i32) -> (i32, i32) {
    %c0_i32 = arith.constant 0 : i32
    return %arg0, %arg1 : i32, i32
  }
}

module attributes {stable_mosaic.version = 11 : i64} {
  func.func @_timestep_embedding_kernel(%arg0: i32, %arg1: i32, %arg2: memref<16x128xbf16, #tpu.memory_space<vmem>>, %arg3: memref<128x128xbf16, #tpu.memory_space<vmem>>, %arg4: memref<1x128xf32, #tpu.memory_space<vmem>>, %arg5: memref<128x128xbf16, #tpu.memory_space<vmem>>, %arg6: memref<1x128xf32, #tpu.memory_space<vmem>>, %arg7: memref<16x128xf32, #tpu.memory_space<vmem>>) attributes {dimension_semantics = [#tpu.dimension_semantics<parallel>, #tpu.dimension_semantics<parallel>], iteration_bounds = array<i64: 1, 1>, scalar_prefetch = 0 : i64, scratch_operands = 0 : i64, tpu.core_type = #tpu.core_type<tc>, window_params = [{transform_indices = @transform_0, window_bounds = array<i64: 16, 128>}, {pipeline_mode = #tpu.pipeline_mode<synchronous>, transform_indices = @transform_1, window_bounds = array<i64: 128, 128>}, {pipeline_mode = #tpu.pipeline_mode<synchronous>, transform_indices = @transform_2, window_bounds = array<i64: 1, 128>}, {transform_indices = @transform_3, window_bounds = array<i64: 128, 128>}, {transform_indices = @transform_4, window_bounds = array<i64: 1, 128>}, {transform_indices = @transform_5, window_bounds = array<i64: 16, 128>}]} {
    %c0 = arith.constant 0 : index
    %c0_0 = arith.constant 0 : index
    %0 = vector.load %arg2[%c0, %c0_0] : memref<16x128xbf16, #tpu.memory_space<vmem>>, vector<16x128xbf16>
    %c0_1 = arith.constant 0 : index
    %c0_2 = arith.constant 0 : index
    %1 = vector.load %arg3[%c0_1, %c0_2] : memref<128x128xbf16, #tpu.memory_space<vmem>>, vector<128x128xbf16>
    %cst = arith.constant dense<0.000000e+00> : vector<16x128xf32>
    %2 = tpu.matmul %0, %1, %cst {dimension_numbers = #tpu.dot_dimension_numbers<[1], [0], [0], [1], [0, 0, 1, 1], [], []>} : vector<16x128xbf16>, vector<128x128xbf16>, vector<16x128xf32> -> vector<16x128xf32>
    %c0_3 = arith.constant 0 : index
    %c0_4 = arith.constant 0 : index
    %3 = vector.load %arg4[%c0_3, %c0_4] : memref<1x128xf32, #tpu.memory_space<vmem>>, vector<1x128xf32>
    %4 = vector.broadcast %3 : vector<1x128xf32> to vector<16x128xf32>
    %5 = arith.addf %2, %4 : vector<16x128xf32>
    %cst_5 = arith.constant 0.000000e+00 : f32
    %6 = vector.broadcast %cst_5 : f32 to vector<16x128xf32>
    %7 = arith.maximumf %5, %6 : vector<16x128xf32>
    %8 = arith.truncf %7 : vector<16x128xf32> to vector<16x128xbf16>
    %c0_6 = arith.constant 0 : index
    %c0_7 = arith.constant 0 : index
    %9 = vector.load %arg5[%c0_6, %c0_7] : memref<128x128xbf16, #tpu.memory_space<vmem>>, vector<128x128xbf16>
    %cst_8 = arith.constant dense<0.000000e+00> : vector<16x128xf32>
    %10 = tpu.matmul %8, %9, %cst_8 {dimension_numbers = #tpu.dot_dimension_numbers<[1], [0], [0], [1], [0, 0, 1, 1], [], []>} : vector<16x128xbf16>, vector<128x128xbf16>, vector<16x128xf32> -> vector<16x128xf32>
    %c0_9 = arith.constant 0 : index
    %c0_10 = arith.constant 0 : index
    %11 = vector.load %arg6[%c0_9, %c0_10] : memref<1x128xf32, #tpu.memory_space<vmem>>, vector<1x128xf32>
    %12 = vector.broadcast %11 : vector<1x128xf32> to vector<16x128xf32>
    %13 = arith.addf %10, %12 : vector<16x128xf32>
    %cst_11 = arith.constant 0.000000e+00 : f32
    %14 = vector.broadcast %cst_11 : f32 to vector<16x128xf32>
    %15 = arith.maximumf %13, %14 : vector<16x128xf32>
    %c0_12 = arith.constant 0 : index
    %c0_13 = arith.constant 0 : index
    %16 = vector.load %arg7[%c0_12, %c0_13] : memref<16x128xf32, #tpu.memory_space<vmem>>, vector<16x128xf32>
    tpu.vector_store %arg7[%c0_12, %c0_13], %15 {strides = array<i32>} : memref<16x128xf32, #tpu.memory_space<vmem>>, vector<16x128xf32>,
    return
  }
  func.func @transform_0(%arg0: i32, %arg1: i32) -> (i32, i32) {
    %c0_i32 = arith.constant 0 : i32
    %c0_i32_0 = arith.constant 0 : i32
    return %arg0, %c0_i32 : i32, i32
  }
  func.func @transform_1(%arg0: i32, %arg1: i32) -> (i32, i32) {
    %c0_i32 = arith.constant 0 : i32
    %c0_i32_0 = arith.constant 0 : i32
    %c0_i32_1 = arith.constant 0 : i32
    return %c0_i32, %c0_i32_0 : i32, i32
  }
  func.func @transform_2(%arg0: i32, %arg1: i32) -> (i32, i32) {
    %c0_i32 = arith.constant 0 : i32
    %c0_i32_0 = arith.constant 0 : i32
    %c0_i32_1 = arith.constant 0 : i32
    return %c0_i32, %c0_i32_0 : i32, i32
  }
  func.func @transform_3(%arg0: i32, %arg1: i32) -> (i32, i32) {
    %c0_i32 = arith.constant 0 : i32
    %c0_i32_0 = arith.constant 0 : i32
    return %c0_i32, %arg1 : i32, i32
  }
  func.func @transform_4(%arg0: i32, %arg1: i32) -> (i32, i32) {
    %c0_i32 = arith.constant 0 : i32
    %c0_i32_0 = arith.constant 0 : i32
    return %c0_i32, %arg1 : i32, i32
  }
  func.func @transform_5(%arg0: i32, %arg1: i32) -> (i32, i32) {
    %c0_i32 = arith.constant 0 : i32
    return %arg0, %arg1 : i32, i32
  }
}

</mosaic_0001>

<bundles_post_ra>
// kernel: tpu_custom_call.1
= control target key start
LH: loop header
LB: loop body
LE: loop exit
PB: predicated region body
PF: predicated region fallthrough
CT: control target
= control target key end

     0   :  { %10 = vsyncpa [#allocation3], 0  ;;  %s568_s0 = inlined_call_operand.hbm [shape: bf16[16,128], index: 0, kind: input, shape index: {}]   ;;  %s569_s1 = inlined_call_operand.hbm [shape: bf16[128,128], index: 1, kind: input, shape index: {}]   ;;  %s570_s2 = inlined_call_operand.vmem [shape: f32[1,128], index: 2, kind: input, shape index: {}]   ;;  %s571_s3 = inlined_call_operand.hbm [shape: bf16[128,128], index: 3, kind: input, shape index: {}]   ;;  %s572_s4 = inlined_call_operand.vmem [shape: f32[1,128], index: 4, kind: input, shape index: {}]   ;;  %s573_s5 = inlined_call_operand.hbm [shape: f32[16,128], index: 5, kind: output, shape index: {}]  }
   0x1   :  { %11 = vsyncpa [#allocation6], 0 }
   0x2   :  { %12 = vsyncpa [#allocation4], 0  ;;  %s510_s18 = smov [#allocation5]   ;;  %s511_s20 = smov [#allocation2]  }
   0x3   :  { %s30_s19 = sshll.u32 %s510_s18, 4  ;;  %s18_s21 = sshll.u32 %s511_s20, 4  ;;  %s31_s19 = int_to_ptr.vmem [resolvable:$true] %s30_s19  ;;  %s19_s21 = int_to_ptr.vmem [resolvable:$true] %s18_s21 }
   0x4   :  { %s432_s22 = scalar_lea.vmem %s31_s19, 1024  ;;  %p437_p1 = scmp.lt.s32.totalorder %s31_s19, %s31_s19 }
   0x5   :  { %p433_p0 = scmp.ne.s32.totalorder %s31_s19, %s432_s22  ;;  %p438_p2 = scmp.lt.s32.totalorder %s432_s22, %s432_s22 }
   0x7   :  { %p439_p3 = por %p438_p2, %p437_p1 }
   0x9   :  { %p440_p4 = pnand %p439_p3, %p433_p0 }
   0xb   :  { %443 = shalt.err (!%p440_p4)
}
   0xc   :  { %s512_s23 = smov 64   ;;  %s513_s24 = smov 4  }
   0xd   :  { %36 = dma.hbm_to_vmem [thread:$0]  %s569_s1, 1024, %s31_s19, [#allocation6], %s512_s23, %s512_s23, %s513_s24  }
   0xe   :  { %s452_s27 = scalar_lea.vmem %s19_s21, 128  ;;  %p457_p6 = scmp.lt.s32.totalorder %s19_s21, %s19_s21 }
   0xf   :  { %p453_p5 = scmp.ne.s32.totalorder %s19_s21, %s452_s27  ;;  %p458_p7 = scmp.lt.s32.totalorder %s452_s27, %s452_s27 }
  0x11   :  { %p459_p8 = por %p458_p7, %p457_p6 }
  0x13   :  { %p460_p9 = pnand %p459_p8, %p453_p5 }
  0x15   :  { %463 = shalt.err (!%p460_p9)
}
  0x16   :  { %24 = dma.hbm_to_vmem [thread:$0]  %s568_s0, 128, %s19_s21, [#allocation3], %s512_s23, %s512_s23, %s513_s24  }
  0x17   :  { %s514_s30 = smov [#allocation7]  }
  0x18   :  { %s44_s6 = sshll.u32 %s514_s30, 4  ;;  %s45_s6 = int_to_ptr.vmem [resolvable:$true] %s44_s6 }
  0x19   :  { %s472_s7 = scalar_lea.vmem %s45_s6, 1024  ;;  %p477_p11 = scmp.lt.s32.totalorder %s45_s6, %s45_s6 }
  0x1a   :  { %p473_p10 = scmp.ne.s32.totalorder %s45_s6, %s472_s7  ;;  %p478_p12 = scmp.lt.s32.totalorder %s472_s7, %s472_s7 }
  0x1c   :  { %p479_p13 = por %p478_p12, %p477_p11 }
  0x1e   :  { %p480_p0 = pnand %p479_p13, %p473_p10 }
  0x20   :  { %483 = shalt.err (!%p480_p0)
}
  0x21   :  { %50 = dma.hbm_to_vmem [thread:$0]  %s571_s3, 1024, %s45_s6, [#allocation6], %s512_s23, %s512_s23, %s513_s24  }
  0x22   :  { %504 = dma.done.wait [#allocation3], 128  }
  0x23   :  { %505 = vsyncadd [#allocation3], 4294967168 }
  0x24   :  { %506 = dma.done.wait [#allocation6], 2048  }
  0x25   :  { %507 = vsyncadd [#allocation6], 4294965248  ;;  %v515_v0 = vmov 0.0   ;;  %vm516_vm0 = vmmov 0   ;;  %v407_v1 = vld [vmem:[#allocation5 + $0x38] sm:$0xff]   ;;  %v408_v2 = vld [vmem:[#allocation5 + $0x30] sm:$0xff]  }
  0x26   :  { %357 = vmatprep.subr.bf16.mxu0 %v515_v0  ;;  %373 = vmatprep.mubr.msk.bf16.mxu0 %vm516_vm0, %v515_v0  ;;  %v409_v3 = vld [vmem:[#allocation5 + $0x28] sm:$0xff]   ;;  %v416_v4 = vld [vmem:[#allocation7 + $0x38] sm:$0xff]   ;;  %v410_v5 = vld [vmem:[#allocation5 + $0x20] sm:$0xff]   ;;  %s517_s11 = smov [#allocation8]  }
  0x27   :  { %377 = vmatprep.subr.bf16.mxu1 %v515_v0  ;;  %393 = vmatprep.mubr.msk.bf16.mxu1 %vm516_vm0, %v515_v0  ;;  %v417_v6 = vld [vmem:[#allocation7 + $0x30] sm:$0xff]   ;;  %v411_v7 = vld [vmem:[#allocation5 + $0x18] sm:$0xff]   ;;  %v418_v8 = vld [vmem:[#allocation7 + $0x28] sm:$0xff]  }
  0x28   :  { %358 = vmatpush3.bf16.msra.mxu0 %v407_v1  ;;  %378 = vmatpush3.bf16.msra.mxu1 %v416_v4  ;;  %v412_v9 = vld [vmem:[#allocation5 + $0x10] sm:$0xff]   ;;  %v419_v10 = vld [vmem:[#allocation7 + $0x20] sm:$0xff]   ;;  %v413_v11 = vld [vmem:[#allocation5 + $0x8] sm:$0xff]  }
  0x29   :  { %359 = vmatprep.subr.bf16.mxu0 %v515_v0  ;;  %379 = vmatprep.subr.bf16.mxu1 %v515_v0  ;;  %v420_v12 = vld [vmem:[#allocation7 + $0x18] sm:$0xff]   ;;  %v414_v13 = vld [vmem:[#allocation5] sm:$0xff]   ;;  %v421_v15 = vld [vmem:[#allocation7 + $0x10] sm:$0xff]  }
  0x2a   :  { %v415_v14 = vld [vmem:[#allocation2] sm:$0xff]   ;;  %v422_v16 = vld [vmem:[#allocation7 + $0x8] sm:$0xff]   ;;  %v423_v17 = vld [vmem:[#allocation7] sm:$0xff]  }
  0x2b   :  { %v320_v18 = vld [vmem:[%s570_s2] ss:$0 sm:$0xff]  ;;  %s307_s2 = sshll.u32 %s517_s11, 4  ;;  %s308_s2 = int_to_ptr.vmem [resolvable:$true] %s307_s2 }
  0x2c   :  { %360 = vmatpush3.bf16.msra.mxu0 %v408_v2  ;;  %380 = vmatpush3.bf16.msra.mxu1 %v417_v6  ;;  %v330_v28 = vld [vmem:[%s572_s4] ss:$0 sm:$0xff]  ;;  %s484_s12 = scalar_lea.vmem %s308_s2, 256  ;;  %p489_p2 = scmp.lt.s32.totalorder %s308_s2, %s308_s2 }
  0x2d   :  { %361 = vmatprep.subr.bf16.mxu0 %v515_v0  ;;  %381 = vmatprep.subr.bf16.mxu1 %v515_v0  ;;  %p485_p1 = scmp.ne.s32.totalorder %s308_s2, %s484_s12  ;;  %p490_p3 = scmp.lt.s32.totalorder %s484_s12, %s484_s12 }
  0x2f   :  { %p491_p4 = por %p490_p3, %p489_p2 }
  0x30   :  { %362 = vmatpush3.bf16.msra.mxu0 %v409_v3  ;;  %382 = vmatpush3.bf16.msra.mxu1 %v418_v8 }
  0x31   :  { %363 = vmatprep.subr.bf16.mxu0 %v515_v0  ;;  %383 = vmatprep.subr.bf16.mxu1 %v515_v0  ;;  %p492_p5 = pnand %p491_p4, %p485_p1 }
  0x34   :  { %364 = vmatpush3.bf16.msra.mxu0 %v410_v5  ;;  %384 = vmatpush3.bf16.msra.mxu1 %v419_v10 }
  0x35   :  { %365 = vmatprep.subr.bf16.mxu0 %v515_v0  ;;  %385 = vmatprep.subr.bf16.mxu1 %v515_v0 }
  0x38   :  { %366 = vmatpush3.bf16.msra.mxu0 %v411_v7  ;;  %386 = vmatpush3.bf16.msra.mxu1 %v420_v12 }
  0x39   :  { %367 = vmatprep.subr.bf16.mxu0 %v515_v0  ;;  %387 = vmatprep.subr.bf16.mxu1 %v515_v0 }
  0x3c   :  { %368 = vmatpush3.bf16.msra.mxu0 %v412_v9  ;;  %388 = vmatpush3.bf16.msra.mxu1 %v421_v15 }
  0x3d   :  { %369 = vmatprep.subr.bf16.mxu0 %v515_v0  ;;  %389 = vmatprep.subr.bf16.mxu1 %v515_v0 }
  0x40   :  { %370 = vmatpush3.bf16.msra.mxu0 %v413_v11  ;;  %390 = vmatpush3.bf16.msra.mxu1 %v422_v16 }
  0x41   :  { %371 = vmatprep.subr.bf16.mxu0 %v515_v0  ;;  %391 = vmatprep.subr.bf16.mxu1 %v515_v0 }
  0x44   :  { %372 = vmatpush3.bf16.msra.mxu0 %v414_v13  ;;  %392 = vmatpush3.bf16.msra.mxu1 %v423_v17 }
  0x47   :  { %374 = vmatmul.mubr.bf16.vlgmr.msra.gmra.mxu0 %v415_v14 }
 0x107   :  { %v176_v19 = vpop.f32.mrf.mxu0 }
 0x108   :  { %v177_v21 = vadd.f32 %v320_v18, %v176_v19 }
 0x109   :  { %v375_v20 = vpop.f32.mrf.mxu0 }
 0x10a   :  { %v183_v25 = vmax.f32 %v177_v21, 0.0 }
 0x10b   :  { %v179_v22 = vpop.f32.mrf.mxu0 }
 0x10c   :  { %v180_v23 = vadd.f32 %v320_v18, %v179_v22 }
 0x10d   :  { %v376_v24 = vpop.f32.mrf.mxu0 }
 0x10e   :  { %v184_v26 = vmax.f32 %v180_v23, 0.0 }
 0x110   :  { %v185_v27 = vpack.c.bf16 %v184_v26, %v183_v25 }
 0x112   :  { %394 = vmatmul.mubr.bf16.vlgmr.msra.gmra.mxu1 %v185_v27 }
 0x1d2   :  { %v291_v29 = vpop.f32.mrf.mxu1 }
 0x1d3   :  { %v292_v30 = vadd.f32 %v330_v28, %v291_v29 }
 0x1d4   :  { %v395_v31 = vpop.f32.mrf.mxu1 }
 0x1d5   :  { %v298_v32 = vmax.f32 %v292_v30, 0.0 }
 0x1d6   :  { %v294_v33 = vpop.f32.mrf.mxu1 }
 0x1d7   :  { %300 = vst [vmem:[#allocation8] sm:$0xff] %v298_v32  ;;  %v295_v34 = vadd.f32 %v330_v28, %v294_v33 }
 0x1d8   :  { %v396_v35 = vpop.f32.mrf.mxu1 }
 0x1d9   :  { %v299_v36 = vmax.f32 %v295_v34, 0.0 }
 0x1db   :  { %301 = vst [vmem:[#allocation8 + $0x8] sm:$0xff] %v299_v36 }
 0x1dc   :  { %495 = shalt.err (!%p492_p5)
}
 0x1dd   :  { %s518_s4 = smov 128   ;;  %s519_s13 = smov 8  }
 0x1de   :  { %313 = dma.vmem_to_hbm [thread:$0]  %s308_s2, 256, %s573_s5, [#allocation4], %s518_s4, %s518_s4, %s519_s13  }
 0x1df   :  { %508 = dma.done.wait [#allocation4], 256  }
 0x1e0   :  { %509 = vsyncadd [#allocation4], 4294967040 }
 0x1e1   :  { %317 = vsyncpa [#allocation3], 1 }
 0x1e2   :  { %318 = vsyncpa [#allocation6], 1 }
 0x1e3   :  { %319 = vsyncpa [#allocation4], 1 }

// kernel: tpu_custom_call.1
= control target key start
LH: loop header
LB: loop body
LE: loop exit
PB: predicated region body
PF: predicated region fallthrough
CT: control target
= control target key end

     0   :  { %10 = vsyncpa [#allocation3], 0  ;;  %s568_s0 = inlined_call_operand.hbm [shape: bf16[16,128], index: 0, kind: input, shape index: {}]   ;;  %s569_s1 = inlined_call_operand.hbm [shape: bf16[128,128], index: 1, kind: input, shape index: {}]   ;;  %s570_s2 = inlined_call_operand.vmem [shape: f32[1,128], index: 2, kind: input, shape index: {}]   ;;  %s571_s3 = inlined_call_operand.hbm [shape: bf16[128,128], index: 3, kind: input, shape index: {}]   ;;  %s572_s4 = inlined_call_operand.vmem [shape: f32[1,128], index: 4, kind: input, shape index: {}]   ;;  %s573_s5 = inlined_call_operand.hbm [shape: f32[16,128], index: 5, kind: output, shape index: {}]  }
   0x1   :  { %11 = vsyncpa [#allocation6], 0 }
   0x2   :  { %12 = vsyncpa [#allocation4], 0  ;;  %s510_s18 = smov [#allocation5]   ;;  %s511_s20 = smov [#allocation2]  }
   0x3   :  { %s30_s19 = sshll.u32 %s510_s18, 4  ;;  %s18_s21 = sshll.u32 %s511_s20, 4  ;;  %s31_s19 = int_to_ptr.vmem [resolvable:$true] %s30_s19  ;;  %s19_s21 = int_to_ptr.vmem [resolvable:$true] %s18_s21 }
   0x4   :  { %s432_s22 = scalar_lea.vmem %s31_s19, 1024  ;;  %p437_p1 = scmp.lt.s32.totalorder %s31_s19, %s31_s19 }
   0x5   :  { %p433_p0 = scmp.ne.s32.totalorder %s31_s19, %s432_s22  ;;  %p438_p2 = scmp.lt.s32.totalorder %s432_s22, %s432_s22 }
   0x7   :  { %p439_p3 = por %p438_p2, %p437_p1 }
   0x9   :  { %p440_p4 = pnand %p439_p3, %p433_p0 }
   0xb   :  { %443 = shalt.err (!%p440_p4)
}
   0xc   :  { %s512_s23 = smov 64   ;;  %s513_s24 = smov 4  }
   0xd   :  { %36 = dma.hbm_to_vmem [thread:$0]  %s569_s1, 1024, %s31_s19, [#allocation6], %s512_s23, %s512_s23, %s513_s24  }
   0xe   :  { %s452_s27 = scalar_lea.vmem %s19_s21, 128  ;;  %p457_p6 = scmp.lt.s32.totalorder %s19_s21, %s19_s21 }
   0xf   :  { %p453_p5 = scmp.ne.s32.totalorder %s19_s21, %s452_s27  ;;  %p458_p7 = scmp.lt.s32.totalorder %s452_s27, %s452_s27 }
  0x11   :  { %p459_p8 = por %p458_p7, %p457_p6 }
  0x13   :  { %p460_p9 = pnand %p459_p8, %p453_p5 }
  0x15   :  { %463 = shalt.err (!%p460_p9)
}
  0x16   :  { %24 = dma.hbm_to_vmem [thread:$0]  %s568_s0, 128, %s19_s21, [#allocation3], %s512_s23, %s512_s23, %s513_s24  }
  0x17   :  { %s514_s30 = smov [#allocation7]  }
  0x18   :  { %s44_s6 = sshll.u32 %s514_s30, 4  ;;  %s45_s6 = int_to_ptr.vmem [resolvable:$true] %s44_s6 }
  0x19   :  { %s472_s7 = scalar_lea.vmem %s45_s6, 1024  ;;  %p477_p11 = scmp.lt.s32.totalorder %s45_s6, %s45_s6 }
  0x1a   :  { %p473_p10 = scmp.ne.s32.totalorder %s45_s6, %s472_s7  ;;  %p478_p12 = scmp.lt.s32.totalorder %s472_s7, %s472_s7 }
  0x1c   :  { %p479_p13 = por %p478_p12, %p477_p11 }
  0x1e   :  { %p480_p0 = pnand %p479_p13, %p473_p10 }
  0x20   :  { %483 = shalt.err (!%p480_p0)
}
  0x21   :  { %50 = dma.hbm_to_vmem [thread:$0]  %s571_s3, 1024, %s45_s6, [#allocation6], %s512_s23, %s512_s23, %s513_s24  }
  0x22   :  { %504 = dma.done.wait [#allocation3], 128  }
  0x23   :  { %505 = vsyncadd [#allocation3], 4294967168 }
  0x24   :  { %506 = dma.done.wait [#allocation6], 2048  }
  0x25   :  { %507 = vsyncadd [#allocation6], 4294965248  ;;  %v515_v0 = vmov 0.0   ;;  %vm516_vm0 = vmmov 0   ;;  %v407_v1 = vld [vmem:[#allocation5 + $0x38] sm:$0xff]   ;;  %v408_v2 = vld [vmem:[#allocation5 + $0x30] sm:$0xff]  }
  0x26   :  { %357 = vmatprep.subr.bf16.mxu0 %v515_v0  ;;  %373 = vmatprep.mubr.msk.bf16.mxu0 %vm516_vm0, %v515_v0  ;;  %v409_v3 = vld [vmem:[#allocation5 + $0x28] sm:$0xff]   ;;  %v416_v4 = vld [vmem:[#allocation7 + $0x38] sm:$0xff]   ;;  %v410_v5 = vld [vmem:[#allocation5 + $0x20] sm:$0xff]   ;;  %s517_s11 = smov [#allocation8]  }
  0x27   :  { %377 = vmatprep.subr.bf16.mxu1 %v515_v0  ;;  %393 = vmatprep.mubr.msk.bf16.mxu1 %vm516_vm0, %v515_v0  ;;  %v417_v6 = vld [vmem:[#allocation7 + $0x30] sm:$0xff]   ;;  %v411_v7 = vld [vmem:[#allocation5 + $0x18] sm:$0xff]   ;;  %v418_v8 = vld [vmem:[#allocation7 + $0x28] sm:$0xff]  }
  0x28   :  { %358 = vmatpush3.bf16.msra.mxu0 %v407_v1  ;;  %378 = vmatpush3.bf16.msra.mxu1 %v416_v4  ;;  %v412_v9 = vld [vmem:[#allocation5 + $0x10] sm:$0xff]   ;;  %v419_v10 = vld [vmem:[#allocation7 + $0x20] sm:$0xff]   ;;  %v413_v11 = vld [vmem:[#allocation5 + $0x8] sm:$0xff]  }
  0x29   :  { %359 = vmatprep.subr.bf16.mxu0 %v515_v0  ;;  %379 = vmatprep.subr.bf16.mxu1 %v515_v0  ;;  %v420_v12 = vld [vmem:[#allocation7 + $0x18] sm:$0xff]   ;;  %v414_v13 = vld [vmem:[#allocation5] sm:$0xff]   ;;  %v421_v15 = vld [vmem:[#allocation7 + $0x10] sm:$0xff]  }
  0x2a   :  { %v415_v14 = vld [vmem:[#allocation2] sm:$0xff]   ;;  %v422_v16 = vld [vmem:[#allocation7 + $0x8] sm:$0xff]   ;;  %v423_v17 = vld [vmem:[#allocation7] sm:$0xff]  }
  0x2b   :  { %v320_v18 = vld [vmem:[%s570_s2] ss:$0 sm:$0xff]  ;;  %s307_s2 = sshll.u32 %s517_s11, 4  ;;  %s308_s2 = int_to_ptr.vmem [resolvable:$true] %s307_s2 }
  0x2c   :  { %360 = vmatpush3.bf16.msra.mxu0 %v408_v2  ;;  %380 = vmatpush3.bf16.msra.mxu1 %v417_v6  ;;  %v330_v28 = vld [vmem:[%s572_s4] ss:$0 sm:$0xff]  ;;  %s484_s12 = scalar_lea.vmem %s308_s2, 256  ;;  %p489_p2 = scmp.lt.s32.totalorder %s308_s2, %s308_s2 }
  0x2d   :  { %361 = vmatprep.subr.bf16.mxu0 %v515_v0  ;;  %381 = vmatprep.subr.bf16.mxu1 %v515_v0  ;;  %p485_p1 = scmp.ne.s32.totalorder %s308_s2, %s484_s12  ;;  %p490_p3 = scmp.lt.s32.totalorder %s484_s12, %s484_s12 }
  0x2f   :  { %p491_p4 = por %p490_p3, %p489_p2 }
  0x30   :  { %362 = vmatpush3.bf16.msra.mxu0 %v409_v3  ;;  %382 = vmatpush3.bf16.msra.mxu1 %v418_v8 }
  0x31   :  { %363 = vmatprep.subr.bf16.mxu0 %v515_v0  ;;  %383 = vmatprep.subr.bf16.mxu1 %v515_v0  ;;  %p492_p5 = pnand %p491_p4, %p485_p1 }
  0x34   :  { %364 = vmatpush3.bf16.msra.mxu0 %v410_v5  ;;  %384 = vmatpush3.bf16.msra.mxu1 %v419_v10 }
  0x35   :  { %365 = vmatprep.subr.bf16.mxu0 %v515_v0  ;;  %385 = vmatprep.subr.bf16.mxu1 %v515_v0 }
  0x38   :  { %366 = vmatpush3.bf16.msra.mxu0 %v411_v7  ;;  %386 = vmatpush3.bf16.msra.mxu1 %v420_v12 }
  0x39   :  { %367 = vmatprep.subr.bf16.mxu0 %v515_v0  ;;  %387 = vmatprep.subr.bf16.mxu1 %v515_v0 }
  0x3c   :  { %368 = vmatpush3.bf16.msra.mxu0 %v412_v9  ;;  %388 = vmatpush3.bf16.msra.mxu1 %v421_v15 }
  0x3d   :  { %369 = vmatprep.subr.bf16.mxu0 %v515_v0  ;;  %389 = vmatprep.subr.bf16.mxu1 %v515_v0 }
  0x40   :  { %370 = vmatpush3.bf16.msra.mxu0 %v413_v11  ;;  %390 = vmatpush3.bf16.msra.mxu1 %v422_v16 }
  0x41   :  { %371 = vmatprep.subr.bf16.mxu0 %v515_v0  ;;  %391 = vmatprep.subr.bf16.mxu1 %v515_v0 }
  0x44   :  { %372 = vmatpush3.bf16.msra.mxu0 %v414_v13  ;;  %392 = vmatpush3.bf16.msra.mxu1 %v423_v17 }
  0x47   :  { %374 = vmatmul.mubr.bf16.vlgmr.msra.gmra.mxu0 %v415_v14 }
 0x107   :  { %v176_v19 = vpop.f32.mrf.mxu0 }
 0x108   :  { %v177_v21 = vadd.f32 %v320_v18, %v176_v19 }
 0x109   :  { %v375_v20 = vpop.f32.mrf.mxu0 }
 0x10a   :  { %v183_v25 = vmax.f32 %v177_v21, 0.0 }
 0x10b   :  { %v179_v22 = vpop.f32.mrf.mxu0 }
 0x10c   :  { %v180_v23 = vadd.f32 %v320_v18, %v179_v22 }
 0x10d   :  { %v376_v24 = vpop.f32.mrf.mxu0 }
 0x10e   :  { %v184_v26 = vmax.f32 %v180_v23, 0.0 }
 0x110   :  { %v185_v27 = vpack.c.bf16 %v184_v26, %v183_v25 }
 0x112   :  { %394 = vmatmul.mubr.bf16.vlgmr.msra.gmra.mxu1 %v185_v27 }
 0x1d2   :  { %v291_v29 = vpop.f32.mrf.mxu1 }
 0x1d3   :  { %v292_v30 = vadd.f32 %v330_v28, %v291_v29 }
 0x1d4   :  { %v395_v31 = vpop.f32.mrf.mxu1 }
 0x1d5   :  { %v298_v32 = vmax.f32 %v292_v30, 0.0 }
 0x1d6   :  { %v294_v33 = vpop.f32.mrf.mxu1 }
 0x1d7   :  { %300 = vst [vmem:[#allocation8] sm:$0xff] %v298_v32  ;;  %v295_v34 = vadd.f32 %v330_v28, %v294_v33 }
 0x1d8   :  { %v396_v35 = vpop.f32.mrf.mxu1 }
 0x1d9   :  { %v299_v36 = vmax.f32 %v295_v34, 0.0 }
 0x1db   :  { %301 = vst [vmem:[#allocation8 + $0x8] sm:$0xff] %v299_v36 }
 0x1dc   :  { %495 = shalt.err (!%p492_p5)
}
 0x1dd   :  { %s518_s4 = smov 128   ;;  %s519_s13 = smov 8  }
 0x1de   :  { %313 = dma.vmem_to_hbm [thread:$0]  %s308_s2, 256, %s573_s5, [#allocation4], %s518_s4, %s518_s4, %s519_s13  }
 0x1df   :  { %508 = dma.done.wait [#allocation4], 256  }
 0x1e0   :  { %509 = vsyncadd [#allocation4], 4294967040 }
 0x1e1   :  { %317 = vsyncpa [#allocation3], 1 }
 0x1e2   :  { %318 = vsyncpa [#allocation6], 1 }
 0x1e3   :  { %319 = vsyncpa [#allocation4], 1 }

</bundles_post_ra>
